<compile_context>
chip_gen: v7x
topology: tpu7x:2x2x1
jax: 0.10.0
libtpu: 0.0.40
codegen_flags: <defaults>
</compile_context>

<pallas_src>
import jax
import jax.numpy as jnp
from jax.experimental import pallas as pl
from jax.experimental.pallas import tpu as pltpu

_SMALL_B_BYPASS = 4096  # below this, fused XLA beats a custom-call launch


def _linear_combine_kernel(x_ref, y_ref, wx_ref, wy_ref, b_ref, o_ref):
    # Two MXU pushes on pre-split weight slabs (no in-VMEM lane concat).
    # f32 accumulation, f32 bias add + sigmoid (EUP), cast on store.
    acc = jnp.dot(x_ref[...], wx_ref[...], preferred_element_type=jnp.float32)
    acc = acc + jnp.dot(y_ref[...], wy_ref[...],
                        preferred_element_type=jnp.float32)
    acc = acc + b_ref[...].astype(jnp.float32)
    o_ref[...] = jax.nn.sigmoid(acc).astype(o_ref.dtype)


def _padded_block_bytes(rows, cols, dtype):
    """VMEM bytes of a (rows, cols) block after (sublane, 128-lane) padding."""
    itemsize = jnp.dtype(dtype).itemsize
    sub = 8 * max(1, 4 // itemsize)          # f32: 8, bf16: 16, int8/fp8: 32
    pr = ((rows + sub - 1) // sub) * sub
    pc = ((cols + 127) // 128) * 128
    return pr * pc * itemsize


def _vmem_capacity_bytes():
    try:
        return int(pltpu.get_tpu_info().vmem_capacity_bytes)
    except Exception:
        return 64 * 1024 * 1024              # conservative: v7x per-TC VMEM


def _generation_tiling():
    """(max batch tile, vmem_limit cap) chosen per TPU generation."""
    if _vmem_capacity_bytes() >= 100 * 1024 * 1024:   # v5e / v6e: 128 MiB VMEM
        return 16384, 64 * 1024 * 1024
    return 8192, 40 * 1024 * 1024                     # v7x: 64 MiB VMEM per TC


def _dimension_semantics_candidates():
    try:
        kind = jax.devices()[0].device_kind.lower()
    except Exception:
        kind = ""
    if "v7" in kind:
        # v7x has 2 TensorCores per chip: shard the batch grid across them.
        return ((pltpu.CORE_PARALLEL,), ("parallel",))
    return (("parallel",),)


def linear_combine(x, y, weight, bias, *, batch_tile=None, force_pallas=False):
    """x: (B, E1), y: (B, E2), weight: (27, E1+E2), bias: (27,) -> (B, 27).

    Matches torch: sigmoid(cat([x, y], dim=1) @ weight.T + bias).
    Compute / I/O dtype follows x.dtype (bf16 halves HBM traffic); the MXU
    accumulation and the sigmoid are always f32.
    """
    B, E1 = x.shape
    B2, E2 = y.shape
    assert B == B2, "x and y must share the batch dimension"
    out_dim, E = weight.shape
    assert E == E1 + E2

    cdt = x.dtype
    y = y.astype(cdt)
    wx = weight[:, :E1].T.astype(cdt)          # (E1, 27)
    wy = weight[:, E1:].T.astype(cdt)          # (E2, 27)
    b2 = bias.reshape(1, out_dim).astype(jnp.float32)

    # Small-B bypass: custom-call launch + one un-pipelined grid step costs
    # more than the whole op at tiny B -- plain fused XLA is strictly faster.
    if not force_pallas and B < _SMALL_B_BYPASS:
        acc = (jnp.dot(x, wx, preferred_element_type=jnp.float32)
               + jnp.dot(y, wy, preferred_element_type=jnp.float32)
               + b2)
        return jax.nn.sigmoid(acc).astype(cdt)

    tb_cap, vmem_cap = _generation_tiling()
    if batch_tile is not None:
        TB = min(int(batch_tile), B)
    else:
        TB = B if B <= tb_cap else tb_cap      # full-array block is always legal
    grid = (pl.cdiv(B, TB),)

    # Padded, double-buffered VMEM footprint + 25% headroom.
    per_step = (_padded_block_bytes(TB, E1, cdt)
                + _padded_block_bytes(TB, E2, cdt)
                + _padded_block_bytes(TB, out_dim, cdt))
    resident = (_padded_block_bytes(E1, out_dim, cdt)
                + _padded_block_bytes(E2, out_dim, cdt)
                + _padded_block_bytes(1, out_dim, jnp.float32))
    footprint = 2 * (per_step + resident)
    vmem_limit = int(min(vmem_cap,
                         max(8 * 1024 * 1024, footprint + footprint // 4)))

    in_bytes = jnp.dtype(cdt).itemsize
    cost = pl.CostEstimate(
        flops=2 * B * E * out_dim,
        transcendentals=B * out_dim,
        bytes_accessed=(B * (E1 + E2 + out_dim) * in_bytes
                        + E * out_dim * in_bytes + out_dim * 4))

    def _build(dim_sem):
        return pl.pallas_call(
            _linear_combine_kernel,
            out_shape=jax.ShapeDtypeStruct((B, out_dim), cdt),
            grid=grid,
            in_specs=[
                pl.BlockSpec((TB, E1), lambda i: (i, 0)),        # x batch tile
                pl.BlockSpec((TB, E2), lambda i: (i, 0)),        # y batch tile
                pl.BlockSpec((E1, out_dim), lambda i: (0, 0)),   # Wx.T resident
                pl.BlockSpec((E2, out_dim), lambda i: (0, 0)),   # Wy.T resident
                pl.BlockSpec((1, out_dim), lambda i: (0, 0)),    # bias resident
            ],
            out_specs=pl.BlockSpec((TB, out_dim), lambda i: (i, 0)),
            compiler_params=pltpu.CompilerParams(
                dimension_semantics=dim_sem,
                vmem_limit_bytes=vmem_limit),
            cost_estimate=cost,
        )

    last_err = None
    for dim_sem in _dimension_semantics_candidates():
        try:
            return _build(dim_sem)(x, y, wx, wy, b2)
        except Exception as e:     # e.g. CORE_PARALLEL rejected on this config
            last_err = e
    raise last_err


def _reference(x, y, weight, bias):
    xy = jnp.concatenate(
        [x.astype(jnp.float32), y.astype(jnp.float32)], axis=1)
    return jax.nn.sigmoid(xy @ weight.T + bias)


if __name__ == "__main__":
    key = jax.random.PRNGKey(0)
    k_x, k_y, k_w, k_b = jax.random.split(key, 4)

    # Small shapes consistent with the module: encoding_size = 32 (x:16, y:16).
    B, E1, E2, out_dim = 2, 16, 16, 27
    encoding_size = E1 + E2

    x = jax.random.normal(k_x, (B, E1), dtype=jnp.float32)
    y = jax.random.normal(k_y, (B, E2), dtype=jnp.float32)

    # Deterministic parameter init (PyTorch nn.Linear-style uniform bound).
    bound = 1.0 / (encoding_size ** 0.5)
    weight = jax.random.uniform(k_w, (out_dim, encoding_size),
                                dtype=jnp.float32, minval=-bound, maxval=bound)
    bias = jax.random.uniform(k_b, (out_dim,), dtype=jnp.float32,
                              minval=-bound, maxval=bound)

    # Small-shape run through the Pallas kernel itself (bypass disabled).
    out = jax.block_until_ready(
        linear_combine(x, y, weight, bias, force_pallas=True))
    ref = _reference(x, y, weight, bias)
    assert out.shape == (B, out_dim)
    assert jnp.allclose(out, ref, atol=1e-5, rtol=1e-5)

    # Small-B bypass path (fused XLA) must agree too.
    out_bp = jax.block_until_ready(linear_combine(x, y, weight, bias))
    assert jnp.allclose(out_bp, ref, atol=1e-5, rtol=1e-5)

    # Tiled / pipelined path with a ragged last block (3 grid steps).
    Bl = 2304
    xl = jax.random.normal(k_x, (Bl, E1), dtype=jnp.float32)
    yl = jax.random.normal(k_y, (Bl, E2), dtype=jnp.float32)
    outl = jax.block_until_ready(
        linear_combine(xl, yl, weight, bias, batch_tile=1024,
                       force_pallas=True))
    refl = _reference(xl, yl, weight, bias)
    assert outl.shape == (Bl, out_dim)
    assert jnp.allclose(outl, refl, atol=1e-5, rtol=1e-5)

    # bf16 I/O coverage (halved HBM traffic; f32 accumulation inside).
    out_bf = jax.block_until_ready(
        linear_combine(xl.astype(jnp.bfloat16), yl.astype(jnp.bfloat16),
                       weight, bias, batch_tile=1024, force_pallas=True))
    assert out_bf.dtype == jnp.bfloat16
    assert jnp.allclose(out_bf.astype(jnp.float32), refl, atol=3e-2, rtol=3e-2)

    print("KERNEL_OK")
</pallas_src>

<mosaic_0001>
module attributes {stable_mosaic.version = 11 : i64} {
  func.func @_linear_combine_kernel(%arg0: i32, %arg1: memref<2x16xf32, #tpu.memory_space<vmem>>, %arg2: memref<2x16xf32, #tpu.memory_space<vmem>>, %arg3: memref<16x27xf32, #tpu.memory_space<vmem>>, %arg4: memref<16x27xf32, #tpu.memory_space<vmem>>, %arg5: memref<1x27xf32, #tpu.memory_space<vmem>>, %arg6: memref<2x27xf32, #tpu.memory_space<vmem>>) attributes {dimension_semantics = [#tpu.dimension_semantics<parallel>], iteration_bounds = array<i64: 1>, scalar_prefetch = 0 : i64, scratch_operands = 0 : i64, tpu.core_type = #tpu.core_type<tc>, window_params = [{transform_indices = @transform_0, window_bounds = array<i64: 2, 16>}, {transform_indices = @transform_1, window_bounds = array<i64: 2, 16>}, {pipeline_mode = #tpu.pipeline_mode<synchronous>, transform_indices = @transform_2, window_bounds = array<i64: 16, 27>}, {pipeline_mode = #tpu.pipeline_mode<synchronous>, transform_indices = @transform_3, window_bounds = array<i64: 16, 27>}, {pipeline_mode = #tpu.pipeline_mode<synchronous>, transform_indices = @transform_4, window_bounds = array<i64: 1, 27>}, {transform_indices = @transform_5, window_bounds = array<i64: 2, 27>}]} {
    %c0 = arith.constant 0 : index
    %c0_0 = arith.constant 0 : index
    %0 = vector.load %arg1[%c0, %c0_0] : memref<2x16xf32, #tpu.memory_space<vmem>>, vector<2x16xf32>
    %c0_1 = arith.constant 0 : index
    %c0_2 = arith.constant 0 : index
    %1 = vector.load %arg3[%c0_1, %c0_2] : memref<16x27xf32, #tpu.memory_space<vmem>>, vector<16x27xf32>
    %cst = arith.constant dense<0.000000e+00> : vector<2x27xf32>
    %2 = tpu.matmul %0, %1, %cst {dimension_numbers = #tpu.dot_dimension_numbers<[1], [0], [0], [1], [0, 0, 1, 1], [], []>} : vector<2x16xf32>, vector<16x27xf32>, vector<2x27xf32> -> vector<2x27xf32>
    %c0_3 = arith.constant 0 : index
    %c0_4 = arith.constant 0 : index
    %3 = vector.load %arg2[%c0_3, %c0_4] : memref<2x16xf32, #tpu.memory_space<vmem>>, vector<2x16xf32>
    %c0_5 = arith.constant 0 : index
    %c0_6 = arith.constant 0 : index
    %4 = vector.load %arg4[%c0_5, %c0_6] : memref<16x27xf32, #tpu.memory_space<vmem>>, vector<16x27xf32>
    %cst_7 = arith.constant dense<0.000000e+00> : vector<2x27xf32>
    %5 = tpu.matmul %3, %4, %cst_7 {dimension_numbers = #tpu.dot_dimension_numbers<[1], [0], [0], [1], [0, 0, 1, 1], [], []>} : vector<2x16xf32>, vector<16x27xf32>, vector<2x27xf32> -> vector<2x27xf32>
    %6 = arith.addf %2, %5 : vector<2x27xf32>
    %c0_8 = arith.constant 0 : index
    %c0_9 = arith.constant 0 : index
    %7 = vector.load %arg5[%c0_8, %c0_9] : memref<1x27xf32, #tpu.memory_space<vmem>>, vector<1x27xf32>
    %8 = vector.broadcast %7 : vector<1x27xf32> to vector<2x27xf32>
    %9 = arith.addf %6, %8 : vector<2x27xf32>
    %10 = arith.negf %9 : vector<2x27xf32>
    %11 = math.exp %10 : vector<2x27xf32>
    %cst_10 = arith.constant 1.000000e+00 : f32
    %12 = vector.broadcast %cst_10 : f32 to vector<2x27xf32>
    %13 = arith.addf %12, %11 : vector<2x27xf32>
    %14 = arith.divf %12, %13 : vector<2x27xf32>
    %c0_11 = arith.constant 0 : index
    %c0_12 = arith.constant 0 : index
    %15 = vector.load %arg6[%c0_11, %c0_12] : memref<2x27xf32, #tpu.memory_space<vmem>>, vector<2x27xf32>
    tpu.vector_store %arg6[%c0_11, %c0_12], %14 {strides = array<i32>} : memref<2x27xf32, #tpu.memory_space<vmem>>, vector<2x27xf32>,
    return
  }
  func.func @transform_0(%arg0: i32) -> (i32, i32) {
    %c0_i32 = arith.constant 0 : i32
    %c0_i32_0 = arith.constant 0 : i32
    return %arg0, %c0_i32 : i32, i32
  }
  func.func @transform_1(%arg0: i32) -> (i32, i32) {
    %c0_i32 = arith.constant 0 : i32
    %c0_i32_0 = arith.constant 0 : i32
    return %arg0, %c0_i32 : i32, i32
  }
  func.func @transform_2(%arg0: i32) -> (i32, i32) {
    %c0_i32 = arith.constant 0 : i32
    %c0_i32_0 = arith.constant 0 : i32
    %c0_i32_1 = arith.constant 0 : i32
    return %c0_i32, %c0_i32_0 : i32, i32
  }
  func.func @transform_3(%arg0: i32) -> (i32, i32) {
    %c0_i32 = arith.constant 0 : i32
    %c0_i32_0 = arith.constant 0 : i32
    %c0_i32_1 = arith.constant 0 : i32
    return %c0_i32, %c0_i32_0 : i32, i32
  }
  func.func @transform_4(%arg0: i32) -> (i32, i32) {
    %c0_i32 = arith.constant 0 : i32
    %c0_i32_0 = arith.constant 0 : i32
    %c0_i32_1 = arith.constant 0 : i32
    return %c0_i32, %c0_i32_0 : i32, i32
  }
  func.func @transform_5(%arg0: i32) -> (i32, i32) {
    %c0_i32 = arith.constant 0 : i32
    %c0_i32_0 = arith.constant 0 : i32
    return %arg0, %c0_i32 : i32, i32
  }
}

</mosaic_0001>

<bundles_post_ra>
// kernel: tpu_custom_call.1
= control target key start
LH: loop header
LB: loop body
LE: loop exit
PB: predicated region body
PF: predicated region fallthrough
CT: control target
= control target key end

     0   :  { %10 = vsyncpa [#allocation3], 0  ;;  %s481_s0 = inlined_call_operand.hbm [shape: f32[2,16], index: 0, kind: input, shape index: {}]   ;;  %s482_s1 = inlined_call_operand.vmem [shape: f32[2,16], index: 1, kind: input, shape index: {}]   ;;  %s483_s2 = inlined_call_operand.hbm [shape: f32[16,27], index: 2, kind: input, shape index: {}]   ;;  %s484_s3 = inlined_call_operand.hbm [shape: f32[16,27], index: 3, kind: input, shape index: {}]   ;;  %s485_s4 = inlined_call_operand.vmem [shape: f32[1,27], index: 4, kind: input, shape index: {}]   ;;  %s486_s5 = inlined_call_operand.hbm [shape: f32[2,27], index: 5, kind: output, shape index: {}]  }
   0x1   :  { %11 = vsyncpa [#allocation6], 0 }
   0x2   :  { %12 = vsyncpa [#allocation4], 0  ;;  %s382_s18 = smov [#allocation5]   ;;  %s288_s22 = scalar_lea.hbm %s483_s2, 256 }
   0x3   :  { %s30_s19 = sshll.u32 %s382_s18, 4  ;;  %p289_p0 = scmp.ne.s32.totalorder %s483_s2, %s288_s22  ;;  %s31_s19 = int_to_ptr.vmem [resolvable:$true] %s30_s19 }
   0x4   :  { %p292_p1 = scmp.lt.u32.totalorder %s288_s22, %s483_s2 }
   0x6   :  { %p294_p2 = pnand %p292_p1, %p289_p0 }
   0x8   :  { %297 = shalt.err (!%p294_p2)
}
   0x9   :  { %s298_s27 = scalar_lea.vmem %s31_s19, 256  ;;  %p303_p4 = scmp.lt.s32.totalorder %s31_s19, %s31_s19 }
   0xa   :  { %p299_p3 = scmp.ne.s32.totalorder %s31_s19, %s298_s27  ;;  %p304_p5 = scmp.lt.s32.totalorder %s298_s27, %s298_s27 }
   0xc   :  { %p305_p6 = por %p304_p5, %p303_p4 }
   0xe   :  { %p306_p7 = pnand %p305_p6, %p299_p3 }
  0x10   :  { %309 = shalt.err (!%p306_p7)
}
  0x11   :  { %s383_s28 = smov 128   ;;  %s384_s29 = smov 8  }
  0x12   :  { %36 = dma.hbm_to_vmem [thread:$0]  %s483_s2, 256, %s31_s19, [#allocation6], %s383_s28, %s383_s28, %s384_s29  }
  0x13   :  { %s385_s7 = smov [#allocation2]   ;;  %s386_s9 = smov [#allocation7]  }
  0x14   :  { %s19_s8 = sshll.u32 %s385_s7, 4  ;;  %s42_s10 = sshll.u32 %s386_s9, 4  ;;  %s20_s8 = int_to_ptr.vmem [resolvable:$true] %s19_s8  ;;  %s43_s10 = int_to_ptr.vmem [resolvable:$true] %s42_s10 }
  0x15   :  { %s310_s13 = scalar_lea.hbm %s481_s0, 32 }
  0x16   :  { %p311_p8 = scmp.ne.s32.totalorder %s481_s0, %s310_s13  ;;  %p314_p9 = scmp.lt.u32.totalorder %s310_s13, %s481_s0 }
  0x18   :  { %p316_p10 = pnand %p314_p9, %p311_p8 }
  0x1a   :  { %319 = shalt.err (!%p316_p10)
}
  0x1b   :  { %s320_s2 = scalar_lea.vmem %s20_s8, 32  ;;  %p325_p12 = scmp.lt.s32.totalorder %s20_s8, %s20_s8 }
  0x1c   :  { %p321_p11 = scmp.ne.s32.totalorder %s20_s8, %s320_s2  ;;  %p326_p13 = scmp.lt.s32.totalorder %s320_s2, %s320_s2 }
  0x1e   :  { %p327_p0 = por %p326_p13, %p325_p12 }
  0x20   :  { %p328_p1 = pnand %p327_p0, %p321_p11 }
  0x22   :  { %331 = shalt.err (!%p328_p1)
}
  0x23   :  { %22 = dma.hbm_to_vmem [thread:$0]  %s481_s0, 32, %s20_s8, [#allocation3]  }
  0x24   :  { %s332_s22 = scalar_lea.hbm %s484_s3, 256 }
  0x25   :  { %p333_p2 = scmp.ne.s32.totalorder %s484_s3, %s332_s22  ;;  %p336_p3 = scmp.lt.u32.totalorder %s332_s22, %s484_s3 }
  0x27   :  { %p338_p4 = pnand %p336_p3, %p333_p2 }
  0x29   :  { %341 = shalt.err (!%p338_p4)
}
  0x2a   :  { %s342_s27 = scalar_lea.vmem %s43_s10, 256  ;;  %p347_p6 = scmp.lt.s32.totalorder %s43_s10, %s43_s10 }
  0x2b   :  { %p343_p5 = scmp.ne.s32.totalorder %s43_s10, %s342_s27  ;;  %p348_p7 = scmp.lt.s32.totalorder %s342_s27, %s342_s27 }
  0x2d   :  { %p349_p8 = por %p348_p7, %p347_p6 }
  0x2f   :  { %p350_p9 = pnand %p349_p8, %p343_p5 }
  0x31   :  { %353 = shalt.err (!%p350_p9)
}
  0x32   :  { %48 = dma.hbm_to_vmem [thread:$0]  %s484_s3, 256, %s43_s10, [#allocation6], %s383_s28, %s383_s28, %s384_s29  }
  0x33   :  { %376 = dma.done.wait [#allocation3], 32  }
  0x34   :  { %377 = vsyncadd [#allocation3], 4294967264 }
  0x35   :  { %378 = dma.done.wait [#allocation6], 512  }
  0x36   :  { %379 = vsyncadd [#allocation6], 4294966784  ;;  %v387_v0 = vmov 0.0|0.0   ;;  %vm388_vm0 = vmmov 0   ;;  %v389_v1 = vmov 0.0   ;;  %v64_v2 = vld [vmem:[#allocation7] sm:$0xff] }
  0x37   :  { %269 = vmatprep.subr.bf16.mxu0 %v387_v0  ;;  %272 = vmatprep.subr.bf16.mxu1 %v387_v0  ;;  %v65_v3 = vld [vmem:[#allocation7 + $0x8] sm:$0xff]  ;;  %v61_v4 = vld [vmem:[#allocation5] sm:$0xff]  ;;  %v62_v6 = vld [vmem:[#allocation5 + $0x8] sm:$0xff]  ;;  %vm66_vm1 = vcmask 130048   ;;  %vm227_vm2 = vcmask 214016  }
  0x38   :  { %259 = vmatprep.mubr.msk.f32.mxu0 %vm388_vm0, %v389_v1  ;;  %266 = vmatprep.mubr.msk.f32.mxu1 %vm388_vm0, %v389_v1  ;;  %v270_v5 = vpack.c.bf16 %v65_v3, %v64_v2  ;;  %v273_v7 = vpack.c.bf16 %v62_v6, %v61_v4  ;;  %v63_v8 = vld [vmem:[%s482_s1] sm:$0x3]  ;;  %s390_s1 = smov [#allocation8]  }
  0x39   :  { %v60_v9 = vld [vmem:[#allocation2] sm:$0x3]  ;;  %s235_s7 = sshll.u32 %s390_s1, 4  ;;  %s236_s7 = int_to_ptr.vmem [resolvable:$true] %s235_s7 }
  0x3a   :  { %271 = vmatpush3.bf16.msra.mxu0 %v270_v5  ;;  %274 = vmatpush3.bf16.msra.mxu1 %v273_v7  ;;  %v247_v12 = vld [vmem:[%s485_s4] ss:$0 sm:$0xff]  ;;  %s354_s8 = scalar_lea.vmem %s236_s7, 32  ;;  %p359_p11 = scmp.lt.s32.totalorder %s236_s7, %s236_s7 }
  0x3b   :  { %p355_p10 = scmp.ne.s32.totalorder %s236_s7, %s354_s8  ;;  %p360_p12 = scmp.lt.s32.totalorder %s354_s8, %s354_s8 }
  0x3d   :  { %260 = vmatmul.mubr.msk.f32.vlgmr.msra.gmra.mrb[0].mxu0 %vm66_vm1, %v63_v8  ;;  %267 = vmatmul.mubr.msk.f32.vlgmr.msra.gmra.mrb[0].mxu1 %vm66_vm1, %v60_v9  ;;  %p361_p13 = por %p360_p12, %p359_p11 }
  0x3f   :  { %p362_p0 = pnand %p361_p13, %p355_p10 }
 0x110   :  { %v136_v10 = vpop.f32.mrb[0].mxu0  ;;  %v209_v11 = vpop.f32.mrb[0].mxu1 }
 0x111   :  { %v261_v13 = vpop.f32.mrb[1].mxu0  ;;  %v210_v14 = vadd.f32 %v209_v11, %v136_v10  ;;  %v268_v15 = vpop.f32.mrb[1].mxu1 }
 0x113   :  { %v220_v16 = vadd.f32 %v247_v12, %v210_v14 }
 0x115   :  { %v248_v17 = vmul.f32 -1.442695, %v220_v16 }
 0x117   :  { %284 = vpow2.f32 %v248_v17 }
 0x121   :  { %v285_v18 = vpop.eup %284 }
 0x122   :  { %v224_v19 = vadd.f32 1.0, %v285_v18 }
 0x124   :  { %286 = vrcp.f32 %v224_v19 }
 0x12e   :  { %v287_v20 = vpop.eup %286 }
 0x12f   :  { %228 = vst.msk [vmem:[#allocation8] sm:$0x3] %vm227_vm2, %v287_v20 }
 0x130   :  { %365 = shalt.err (!%p362_p0)
}
 0x131   :  { %s366_s10 = scalar_lea.hbm %s486_s5, 32 }
 0x132   :  { %p367_p1 = scmp.ne.s32.totalorder %s486_s5, %s366_s10  ;;  %p370_p2 = scmp.lt.u32.totalorder %s366_s10, %s486_s5 }
 0x134   :  { %p372_p3 = pnand %p370_p2, %p367_p1 }
 0x136   :  { %375 = shalt.err (!%p372_p3)
}
 0x137   :  { %238 = dma.vmem_to_hbm [thread:$0]  %s236_s7, 32, %s486_s5, [#allocation4]  }
 0x138   :  { %380 = dma.done.wait [#allocation4], 32  }
 0x139   :  { %381 = vsyncadd [#allocation4], 4294967264 }
 0x13a   :  { %242 = vsyncpa [#allocation3], 1 }
 0x13b   :  { %243 = vsyncpa [#allocation6], 1 }
 0x13c   :  { %244 = vsyncpa [#allocation4], 1 }

</bundles_post_ra>
